<compile_context>
chip_gen: v7x
topology: tpu7x:2x2x1
jax: 0.10.0
libtpu: 0.0.40
codegen_flags: <defaults>
</compile_context>

<pallas_src>
import jax
import jax.numpy as jnp
from jax.experimental import pallas as pl
from jax.experimental.pallas import tpu as pltpu


def _conv1x1_kernel(w_ref, b_ref, x_ref, o_ref):
    """Per-pixel channel projection on the VPU with dense (TILE_H, W) slabs.

    w_ref: (C_out * C_in,) f32 in SMEM (flat scalar coefficients)
    b_ref: (C_out,)        f32 in SMEM
    x_ref: (nb, C_in,  TILE_H, W) VMEM block  (nb = 1 or the whole batch)
    o_ref: (nb, C_out, TILE_H, W) VMEM block
    """
    nb, c_in = x_ref.shape[0], x_ref.shape[1]
    c_out = o_ref.shape[1]
    for n in range(nb):                       # nb is small (1, or B <= 8 when folded)
        for o in range(c_out):
            # Bias folded into the first MAC term; scalars broadcast from SMEM.
            acc = x_ref[n, 0].astype(jnp.float32) * w_ref[o * c_in] + b_ref[o]
            for c in range(1, c_in):
                acc = acc + x_ref[n, c].astype(jnp.float32) * w_ref[o * c_in + c]
            # Store this output plane immediately: one dense 2-D store, only one
            # accumulator live at a time (no concatenate / relayout / spills).
            o_ref[n, o] = acc.astype(o_ref.dtype)


def _pick_tile_h(H, row_bytes, target_bytes=2 << 20):
    """Tile height: sublane-dense (multiple of 8), sized so one input block is
    ~target_bytes, preferring exact divisors of H and >= 2 blocks along H so the
    pipeline / megacore sharding have work.  Never returns a giant full-image
    block for large H."""
    if H <= 8:
        return H                                   # full dim: (8,128) rule satisfied
    if H % 8 == 0:
        divs = [th for th in range(8, H + 1, 8) if H % th == 0]
        under = [th for th in divs if th * row_bytes <= target_bytes] or [divs[0]]
        multi = [th for th in under if H // th >= 2]
        return max(multi) if multi else max(under)
    # H not a multiple of 8: take the whole (small) H, or a multiple-of-8 tile
    # with a masked partial last block (op is pointwise, padding is harmless).
    if H * row_bytes <= target_bytes:
        return H
    th = max(8, (target_bytes // row_bytes) // 8 * 8)
    return min(th, (H // 8) * 8)


def msi_embedder1_forward(x_nchw, weight, bias, *, target_block_bytes=2 << 20):
    """1x1 conv (channel projection), matching nn.Conv2d(in_channels, 3, kernel_size=1).

    x_nchw: (B, C_in, H, W)
    weight: (C_out=3, C_in)  (or the raw (3, C_in, 1, 1) conv kernel)
    bias:   (C_out=3,)
    returns (B, 3, H, W)
    """
    B, C_in, H, W = x_nchw.shape
    weight2d = weight.reshape(weight.shape[0], -1)        # accept (3,C,1,1) too
    C_out = weight2d.shape[0]
    itemsize = jnp.dtype(x_nchw.dtype).itemsize
    row_bytes = C_in * W * itemsize

    tile_h = _pick_tile_h(H, row_bytes, target_block_bytes)
    n_h = pl.cdiv(H, tile_h)

    # For small images, fold the whole batch into the block so each grid step
    # moves enough bytes to amortize the fixed per-step overhead; otherwise keep
    # B as a parallel grid axis (more steps to shard across TensorCores).
    per_batch_block_bytes = C_in * tile_h * W * itemsize
    fold_batch = (B > 1 and B <= 8
                  and per_batch_block_bytes < (256 << 10)
                  and B * per_batch_block_bytes <= target_block_bytes)

    w_flat = weight2d.reshape(C_out * C_in).astype(jnp.float32)   # 1-D SMEM, no 2-D padding
    b_flat = bias.reshape(C_out).astype(jnp.float32)

    if fold_batch:
        grid = (n_h,)
        x_spec = pl.BlockSpec((B, C_in, tile_h, W), lambda h: (0, 0, h, 0))
        o_spec = pl.BlockSpec((B, C_out, tile_h, W), lambda h: (0, 0, h, 0))
        dims = ("parallel",)
    else:
        grid = (B, n_h)
        x_spec = pl.BlockSpec((1, C_in, tile_h, W), lambda b, h: (b, 0, h, 0))
        o_spec = pl.BlockSpec((1, C_out, tile_h, W), lambda b, h: (b, 0, h, 0))
        dims = ("parallel", "parallel")

    out = pl.pallas_call(
        _conv1x1_kernel,
        out_shape=jax.ShapeDtypeStruct((B, C_out, H, W), x_nchw.dtype),
        grid_spec=pltpu.PrefetchScalarGridSpec(
            num_scalar_prefetch=0,
            grid=grid,
            in_specs=[
                # Tiny parameter tensors live in SMEM (scalar broadcast, no VMEM tiles).
                pl.BlockSpec(memory_space=pltpu.MemorySpace.SMEM),   # weight (C_out*C_in,)
                pl.BlockSpec(memory_space=pltpu.MemorySpace.SMEM),   # bias   (C_out,)
                x_spec,
            ],
            out_specs=o_spec,
        ),
        compiler_params=pltpu.CompilerParams(dimension_semantics=dims),
    )(w_flat, b_flat, x_nchw)

    return out


if __name__ == "__main__":
    key = jax.random.PRNGKey(0)
    k_x, k_w, k_b = jax.random.split(key, 3)

    B, C_in, H, W = 2, 4, 16, 16
    C_out = 3

    x = jax.random.normal(k_x, (B, C_in, H, W), dtype=jnp.float32)
    # Deterministic parameter init (mirrors Conv2d's uniform bound 1/sqrt(fan_in))
    bound = 1.0 / jnp.sqrt(jnp.float32(C_in))
    weight = jax.random.uniform(k_w, (C_out, C_in), minval=-bound, maxval=bound,
                                dtype=jnp.float32)
    bias = jax.random.uniform(k_b, (C_out,), minval=-bound, maxval=bound,
                              dtype=jnp.float32)

    out = msi_embedder1_forward(x, weight, bias)
    jax.block_until_ready(out)

    # Sanity check against a plain-JAX reference of the 1x1 conv
    ref = jnp.einsum("bchw,oc->bohw", x, weight) + bias[None, :, None, None]
    assert out.shape == (B, C_out, H, W)
    assert jnp.allclose(out, ref, atol=1e-5, rtol=1e-5)

    print("KERNEL_OK")
</pallas_src>

<mosaic_0001>
module attributes {stable_mosaic.version = 11 : i64} {
  func.func @_conv1x1_kernel(%arg0: i32, %arg1: memref<12xf32, #tpu.memory_space<smem>>, %arg2: memref<3xf32, #tpu.memory_space<smem>>, %arg3: memref<2x4x8x16xf32, #tpu.memory_space<vmem>>, %arg4: memref<2x3x8x16xf32, #tpu.memory_space<vmem>>) attributes {dimension_semantics = [#tpu.dimension_semantics<parallel>], iteration_bounds = array<i64: 2>, scalar_prefetch = 0 : i64, scratch_operands = 0 : i64, tpu.core_type = #tpu.core_type<tc>, window_params = [{transform_indices = @transform_0, window_bounds = array<i64: 12>}, {transform_indices = @transform_1, window_bounds = array<i64: 3>}, {transform_indices = @transform_2, window_bounds = array<i64: 2, 4, 8, 16>}, {transform_indices = @transform_3, window_bounds = array<i64: 2, 3, 8, 16>}]} {
    %c0 = arith.constant 0 : index
    %c0_0 = arith.constant 0 : index
    %c0_1 = arith.constant 0 : index
    %c0_2 = arith.constant 0 : index
    %0 = vector.load %arg3[%c0, %c0_0, %c0_1, %c0_2] : memref<2x4x8x16xf32, #tpu.memory_space<vmem>>, vector<1x1x8x16xf32>
    %1 = vector.shape_cast %0 : vector<1x1x8x16xf32> to vector<8x16xf32>
    %c0_3 = arith.constant 0 : index
    %2 = memref.load %arg1[%c0_3] : memref<12xf32, #tpu.memory_space<smem>>
    %3 = vector.broadcast %2 : f32 to vector<8x16xf32>
    %4 = arith.mulf %1, %3 : vector<8x16xf32>
    %c0_4 = arith.constant 0 : index
    %5 = memref.load %arg2[%c0_4] : memref<3xf32, #tpu.memory_space<smem>>
    %6 = vector.broadcast %5 : f32 to vector<8x16xf32>
    %7 = arith.addf %4, %6 : vector<8x16xf32>
    %c0_5 = arith.constant 0 : index
    %c1 = arith.constant 1 : index
    %c0_6 = arith.constant 0 : index
    %c0_7 = arith.constant 0 : index
    %8 = vector.load %arg3[%c0_5, %c1, %c0_6, %c0_7] : memref<2x4x8x16xf32, #tpu.memory_space<vmem>>, vector<1x1x8x16xf32>
    %9 = vector.shape_cast %8 : vector<1x1x8x16xf32> to vector<8x16xf32>
    %c1_8 = arith.constant 1 : index
    %10 = memref.load %arg1[%c1_8] : memref<12xf32, #tpu.memory_space<smem>>
    %11 = vector.broadcast %10 : f32 to vector<8x16xf32>
    %12 = arith.mulf %9, %11 : vector<8x16xf32>
    %13 = arith.addf %7, %12 : vector<8x16xf32>
    %c0_9 = arith.constant 0 : index
    %c2 = arith.constant 2 : index
    %c0_10 = arith.constant 0 : index
    %c0_11 = arith.constant 0 : index
    %14 = vector.load %arg3[%c0_9, %c2, %c0_10, %c0_11] : memref<2x4x8x16xf32, #tpu.memory_space<vmem>>, vector<1x1x8x16xf32>
    %15 = vector.shape_cast %14 : vector<1x1x8x16xf32> to vector<8x16xf32>
    %c2_12 = arith.constant 2 : index
    %16 = memref.load %arg1[%c2_12] : memref<12xf32, #tpu.memory_space<smem>>
    %17 = vector.broadcast %16 : f32 to vector<8x16xf32>
    %18 = arith.mulf %15, %17 : vector<8x16xf32>
    %19 = arith.addf %13, %18 : vector<8x16xf32>
    %c0_13 = arith.constant 0 : index
    %c3 = arith.constant 3 : index
    %c0_14 = arith.constant 0 : index
    %c0_15 = arith.constant 0 : index
    %20 = vector.load %arg3[%c0_13, %c3, %c0_14, %c0_15] : memref<2x4x8x16xf32, #tpu.memory_space<vmem>>, vector<1x1x8x16xf32>
    %21 = vector.shape_cast %20 : vector<1x1x8x16xf32> to vector<8x16xf32>
    %c3_16 = arith.constant 3 : index
    %22 = memref.load %arg1[%c3_16] : memref<12xf32, #tpu.memory_space<smem>>
    %23 = vector.broadcast %22 : f32 to vector<8x16xf32>
    %24 = arith.mulf %21, %23 : vector<8x16xf32>
    %25 = arith.addf %19, %24 : vector<8x16xf32>
    %c0_17 = arith.constant 0 : index
    %c0_18 = arith.constant 0 : index
    %c0_19 = arith.constant 0 : index
    %c0_20 = arith.constant 0 : index
    %26 = vector.load %arg4[%c0_17, %c0_18, %c0_19, %c0_20] : memref<2x3x8x16xf32, #tpu.memory_space<vmem>>, vector<1x1x8x16xf32>
    %27 = vector.shape_cast %26 : vector<1x1x8x16xf32> to vector<8x16xf32>
    %28 = vector.shape_cast %25 : vector<8x16xf32> to vector<1x1x8x16xf32>
    tpu.vector_store %arg4[%c0_17, %c0_18, %c0_19, %c0_20], %28 {strides = array<i32>} : memref<2x3x8x16xf32, #tpu.memory_space<vmem>>, vector<1x1x8x16xf32>,
    %c0_21 = arith.constant 0 : index
    %c0_22 = arith.constant 0 : index
    %c0_23 = arith.constant 0 : index
    %c0_24 = arith.constant 0 : index
    %29 = vector.load %arg3[%c0_21, %c0_22, %c0_23, %c0_24] : memref<2x4x8x16xf32, #tpu.memory_space<vmem>>, vector<1x1x8x16xf32>
    %30 = vector.shape_cast %29 : vector<1x1x8x16xf32> to vector<8x16xf32>
    %c4 = arith.constant 4 : index
    %31 = memref.load %arg1[%c4] : memref<12xf32, #tpu.memory_space<smem>>
    %32 = vector.broadcast %31 : f32 to vector<8x16xf32>
    %33 = arith.mulf %30, %32 : vector<8x16xf32>
    %c1_25 = arith.constant 1 : index
    %34 = memref.load %arg2[%c1_25] : memref<3xf32, #tpu.memory_space<smem>>
    %35 = vector.broadcast %34 : f32 to vector<8x16xf32>
    %36 = arith.addf %33, %35 : vector<8x16xf32>
    %c0_26 = arith.constant 0 : index
    %c1_27 = arith.constant 1 : index
    %c0_28 = arith.constant 0 : index
    %c0_29 = arith.constant 0 : index
    %37 = vector.load %arg3[%c0_26, %c1_27, %c0_28, %c0_29] : memref<2x4x8x16xf32, #tpu.memory_space<vmem>>, vector<1x1x8x16xf32>
    %38 = vector.shape_cast %37 : vector<1x1x8x16xf32> to vector<8x16xf32>
    %c5 = arith.constant 5 : index
    %39 = memref.load %arg1[%c5] : memref<12xf32, #tpu.memory_space<smem>>
    %40 = vector.broadcast %39 : f32 to vector<8x16xf32>
    %41 = arith.mulf %38, %40 : vector<8x16xf32>
    %42 = arith.addf %36, %41 : vector<8x16xf32>
    %c0_30 = arith.constant 0 : index
    %c2_31 = arith.constant 2 : index
    %c0_32 = arith.constant 0 : index
    %c0_33 = arith.constant 0 : index
    %43 = vector.load %arg3[%c0_30, %c2_31, %c0_32, %c0_33] : memref<2x4x8x16xf32, #tpu.memory_space<vmem>>, vector<1x1x8x16xf32>
    %44 = vector.shape_cast %43 : vector<1x1x8x16xf32> to vector<8x16xf32>
    %c6 = arith.constant 6 : index
    %45 = memref.load %arg1[%c6] : memref<12xf32, #tpu.memory_space<smem>>
    %46 = vector.broadcast %45 : f32 to vector<8x16xf32>
    %47 = arith.mulf %44, %46 : vector<8x16xf32>
    %48 = arith.addf %42, %47 : vector<8x16xf32>
    %c0_34 = arith.constant 0 : index
    %c3_35 = arith.constant 3 : index
    %c0_36 = arith.constant 0 : index
    %c0_37 = arith.constant 0 : index
    %49 = vector.load %arg3[%c0_34, %c3_35, %c0_36, %c0_37] : memref<2x4x8x16xf32, #tpu.memory_space<vmem>>, vector<1x1x8x16xf32>
    %50 = vector.shape_cast %49 : vector<1x1x8x16xf32> to vector<8x16xf32>
    %c7 = arith.constant 7 : index
    %51 = memref.load %arg1[%c7] : memref<12xf32, #tpu.memory_space<smem>>
    %52 = vector.broadcast %51 : f32 to vector<8x16xf32>
    %53 = arith.mulf %50, %52 : vector<8x16xf32>
    %54 = arith.addf %48, %53 : vector<8x16xf32>
    %c0_38 = arith.constant 0 : index
    %c1_39 = arith.constant 1 : index
    %c0_40 = arith.constant 0 : index
    %c0_41 = arith.constant 0 : index
    %55 = vector.load %arg4[%c0_38, %c1_39, %c0_40, %c0_41] : memref<2x3x8x16xf32, #tpu.memory_space<vmem>>, vector<1x1x8x16xf32>
    %56 = vector.shape_cast %55 : vector<1x1x8x16xf32> to vector<8x16xf32>
    %57 = vector.shape_cast %54 : vector<8x16xf32> to vector<1x1x8x16xf32>
    tpu.vector_store %arg4[%c0_38, %c1_39, %c0_40, %c0_41], %57 {strides = array<i32>} : memref<2x3x8x16xf32, #tpu.memory_space<vmem>>, vector<1x1x8x16xf32>,
    %c0_42 = arith.constant 0 : index
    %c0_43 = arith.constant 0 : index
    %c0_44 = arith.constant 0 : index
    %c0_45 = arith.constant 0 : index
    %58 = vector.load %arg3[%c0_42, %c0_43, %c0_44, %c0_45] : memref<2x4x8x16xf32, #tpu.memory_space<vmem>>, vector<1x1x8x16xf32>
    %59 = vector.shape_cast %58 : vector<1x1x8x16xf32> to vector<8x16xf32>
    %c8 = arith.constant 8 : index
    %60 = memref.load %arg1[%c8] : memref<12xf32, #tpu.memory_space<smem>>
    %61 = vector.broadcast %60 : f32 to vector<8x16xf32>
    %62 = arith.mulf %59, %61 : vector<8x16xf32>
    %c2_46 = arith.constant 2 : index
    %63 = memref.load %arg2[%c2_46] : memref<3xf32, #tpu.memory_space<smem>>
    %64 = vector.broadcast %63 : f32 to vector<8x16xf32>
    %65 = arith.addf %62, %64 : vector<8x16xf32>
    %c0_47 = arith.constant 0 : index
    %c1_48 = arith.constant 1 : index
    %c0_49 = arith.constant 0 : index
    %c0_50 = arith.constant 0 : index
    %66 = vector.load %arg3[%c0_47, %c1_48, %c0_49, %c0_50] : memref<2x4x8x16xf32, #tpu.memory_space<vmem>>, vector<1x1x8x16xf32>
    %67 = vector.shape_cast %66 : vector<1x1x8x16xf32> to vector<8x16xf32>
    %c9 = arith.constant 9 : index
    %68 = memref.load %arg1[%c9] : memref<12xf32, #tpu.memory_space<smem>>
    %69 = vector.broadcast %68 : f32 to vector<8x16xf32>
    %70 = arith.mulf %67, %69 : vector<8x16xf32>
    %71 = arith.addf %65, %70 : vector<8x16xf32>
    %c0_51 = arith.constant 0 : index
    %c2_52 = arith.constant 2 : index
    %c0_53 = arith.constant 0 : index
    %c0_54 = arith.constant 0 : index
    %72 = vector.load %arg3[%c0_51, %c2_52, %c0_53, %c0_54] : memref<2x4x8x16xf32, #tpu.memory_space<vmem>>, vector<1x1x8x16xf32>
    %73 = vector.shape_cast %72 : vector<1x1x8x16xf32> to vector<8x16xf32>
    %c10 = arith.constant 10 : index
    %74 = memref.load %arg1[%c10] : memref<12xf32, #tpu.memory_space<smem>>
    %75 = vector.broadcast %74 : f32 to vector<8x16xf32>
    %76 = arith.mulf %73, %75 : vector<8x16xf32>
    %77 = arith.addf %71, %76 : vector<8x16xf32>
    %c0_55 = arith.constant 0 : index
    %c3_56 = arith.constant 3 : index
    %c0_57 = arith.constant 0 : index
    %c0_58 = arith.constant 0 : index
    %78 = vector.load %arg3[%c0_55, %c3_56, %c0_57, %c0_58] : memref<2x4x8x16xf32, #tpu.memory_space<vmem>>, vector<1x1x8x16xf32>
    %79 = vector.shape_cast %78 : vector<1x1x8x16xf32> to vector<8x16xf32>
    %c11 = arith.constant 11 : index
    %80 = memref.load %arg1[%c11] : memref<12xf32, #tpu.memory_space<smem>>
    %81 = vector.broadcast %80 : f32 to vector<8x16xf32>
    %82 = arith.mulf %79, %81 : vector<8x16xf32>
    %83 = arith.addf %77, %82 : vector<8x16xf32>
    %c0_59 = arith.constant 0 : index
    %c2_60 = arith.constant 2 : index
    %c0_61 = arith.constant 0 : index
    %c0_62 = arith.constant 0 : index
    %84 = vector.load %arg4[%c0_59, %c2_60, %c0_61, %c0_62] : memref<2x3x8x16xf32, #tpu.memory_space<vmem>>, vector<1x1x8x16xf32>
    %85 = vector.shape_cast %84 : vector<1x1x8x16xf32> to vector<8x16xf32>
    %86 = vector.shape_cast %83 : vector<8x16xf32> to vector<1x1x8x16xf32>
    tpu.vector_store %arg4[%c0_59, %c2_60, %c0_61, %c0_62], %86 {strides = array<i32>} : memref<2x3x8x16xf32, #tpu.memory_space<vmem>>, vector<1x1x8x16xf32>,
    %c1_63 = arith.constant 1 : index
    %c0_64 = arith.constant 0 : index
    %c0_65 = arith.constant 0 : index
    %c0_66 = arith.constant 0 : index
    %87 = vector.load %arg3[%c1_63, %c0_64, %c0_65, %c0_66] : memref<2x4x8x16xf32, #tpu.memory_space<vmem>>, vector<1x1x8x16xf32>
    %88 = vector.shape_cast %87 : vector<1x1x8x16xf32> to vector<8x16xf32>
    %c0_67 = arith.constant 0 : index
    %89 = memref.load %arg1[%c0_67] : memref<12xf32, #tpu.memory_space<smem>>
    %90 = vector.broadcast %89 : f32 to vector<8x16xf32>
    %91 = arith.mulf %88, %90 : vector<8x16xf32>
    %c0_68 = arith.constant 0 : index
    %92 = memref.load %arg2[%c0_68] : memref<3xf32, #tpu.memory_space<smem>>
    %93 = vector.broadcast %92 : f32 to vector<8x16xf32>
    %94 = arith.addf %91, %93 : vector<8x16xf32>
    %c1_69 = arith.constant 1 : index
    %c1_70 = arith.constant 1 : index
    %c0_71 = arith.constant 0 : index
    %c0_72 = arith.constant 0 : index
    %95 = vector.load %arg3[%c1_69, %c1_70, %c0_71, %c0_72] : memref<2x4x8x16xf32, #tpu.memory_space<vmem>>, vector<1x1x8x16xf32>
    %96 = vector.shape_cast %95 : vector<1x1x8x16xf32> to vector<8x16xf32>
    %c1_73 = arith.constant 1 : index
    %97 = memref.load %arg1[%c1_73] : memref<12xf32, #tpu.memory_space<smem>>
    %98 = vector.broadcast %97 : f32 to vector<8x16xf32>
    %99 = arith.mulf %96, %98 : vector<8x16xf32>
    %100 = arith.addf %94, %99 : vector<8x16xf32>
    %c1_74 = arith.constant 1 : index
    %c2_75 = arith.constant 2 : index
    %c0_76 = arith.constant 0 : index
    %c0_77 = arith.constant 0 : index
    %101 = vector.load %arg3[%c1_74, %c2_75, %c0_76, %c0_77] : memref<2x4x8x16xf32, #tpu.memory_space<vmem>>, vector<1x1x8x16xf32>
    %102 = vector.shape_cast %101 : vector<1x1x8x16xf32> to vector<8x16xf32>
    %c2_78 = arith.constant 2 : index
    %103 = memref.load %arg1[%c2_78] : memref<12xf32, #tpu.memory_space<smem>>
    %104 = vector.broadcast %103 : f32 to vector<8x16xf32>
    %105 = arith.mulf %102, %104 : vector<8x16xf32>
    %106 = arith.addf %100, %105 : vector<8x16xf32>
    %c1_79 = arith.constant 1 : index
    %c3_80 = arith.constant 3 : index
    %c0_81 = arith.constant 0 : index
    %c0_82 = arith.constant 0 : index
    %107 = vector.load %arg3[%c1_79, %c3_80, %c0_81, %c0_82] : memref<2x4x8x16xf32, #tpu.memory_space<vmem>>, vector<1x1x8x16xf32>
    %108 = vector.shape_cast %107 : vector<1x1x8x16xf32> to vector<8x16xf32>
    %c3_83 = arith.constant 3 : index
    %109 = memref.load %arg1[%c3_83] : memref<12xf32, #tpu.memory_space<smem>>
    %110 = vector.broadcast %109 : f32 to vector<8x16xf32>
    %111 = arith.mulf %108, %110 : vector<8x16xf32>
    %112 = arith.addf %106, %111 : vector<8x16xf32>
    %c1_84 = arith.constant 1 : index
    %c0_85 = arith.constant 0 : index
    %c0_86 = arith.constant 0 : index
    %c0_87 = arith.constant 0 : index
    %113 = vector.load %arg4[%c1_84, %c0_85, %c0_86, %c0_87] : memref<2x3x8x16xf32, #tpu.memory_space<vmem>>, vector<1x1x8x16xf32>
    %114 = vector.shape_cast %113 : vector<1x1x8x16xf32> to vector<8x16xf32>
    %115 = vector.shape_cast %112 : vector<8x16xf32> to vector<1x1x8x16xf32>
    tpu.vector_store %arg4[%c1_84, %c0_85, %c0_86, %c0_87], %115 {strides = array<i32>} : memref<2x3x8x16xf32, #tpu.memory_space<vmem>>, vector<1x1x8x16xf32>,
    %c1_88 = arith.constant 1 : index
    %c0_89 = arith.constant 0 : index
    %c0_90 = arith.constant 0 : index
    %c0_91 = arith.constant 0 : index
    %116 = vector.load %arg3[%c1_88, %c0_89, %c0_90, %c0_91] : memref<2x4x8x16xf32, #tpu.memory_space<vmem>>, vector<1x1x8x16xf32>
    %117 = vector.shape_cast %116 : vector<1x1x8x16xf32> to vector<8x16xf32>
    %c4_92 = arith.constant 4 : index
    %118 = memref.load %arg1[%c4_92] : memref<12xf32, #tpu.memory_space<smem>>
    %119 = vector.broadcast %118 : f32 to vector<8x16xf32>
    %120 = arith.mulf %117, %119 : vector<8x16xf32>
    %c1_93 = arith.constant 1 : index
    %121 = memref.load %arg2[%c1_93] : memref<3xf32, #tpu.memory_space<smem>>
    %122 = vector.broadcast %121 : f32 to vector<8x16xf32>
    %123 = arith.addf %120, %122 : vector<8x16xf32>
    %c1_94 = arith.constant 1 : index
    %c1_95 = arith.constant 1 : index
    %c0_96 = arith.constant 0 : index
    %c0_97 = arith.constant 0 : index
    %124 = vector.load %arg3[%c1_94, %c1_95, %c0_96, %c0_97] : memref<2x4x8x16xf32, #tpu.memory_space<vmem>>, vector<1x1x8x16xf32>
    %125 = vector.shape_cast %124 : vector<1x1x8x16xf32> to vector<8x16xf32>
    %c5_98 = arith.constant 5 : index
    %126 = memref.load %arg1[%c5_98] : memref<12xf32, #tpu.memory_space<smem>>
    %127 = vector.broadcast %126 : f32 to vector<8x16xf32>
    %128 = arith.mulf %125, %127 : vector<8x16xf32>
    %129 = arith.addf %123, %128 : vector<8x16xf32>
    %c1_99 = arith.constant 1 : index
    %c2_100 = arith.constant 2 : index
    %c0_101 = arith.constant 0 : index
    %c0_102 = arith.constant 0 : index
    %130 = vector.load %arg3[%c1_99, %c2_100, %c0_101, %c0_102] : memref<2x4x8x16xf32, #tpu.memory_space<vmem>>, vector<1x1x8x16xf32>
    %131 = vector.shape_cast %130 : vector<1x1x8x16xf32> to vector<8x16xf32>
    %c6_103 = arith.constant 6 : index
    %132 = memref.load %arg1[%c6_103] : memref<12xf32, #tpu.memory_space<smem>>
    %133 = vector.broadcast %132 : f32 to vector<8x16xf32>
    %134 = arith.mulf %131, %133 : vector<8x16xf32>
    %135 = arith.addf %129, %134 : vector<8x16xf32>
    %c1_104 = arith.constant 1 : index
    %c3_105 = arith.constant 3 : index
    %c0_106 = arith.constant 0 : index
    %c0_107 = arith.constant 0 : index
    %136 = vector.load %arg3[%c1_104, %c3_105, %c0_106, %c0_107] : memref<2x4x8x16xf32, #tpu.memory_space<vmem>>, vector<1x1x8x16xf32>
    %137 = vector.shape_cast %136 : vector<1x1x8x16xf32> to vector<8x16xf32>
    %c7_108 = arith.constant 7 : index
    %138 = memref.load %arg1[%c7_108] : memref<12xf32, #tpu.memory_space<smem>>
    %139 = vector.broadcast %138 : f32 to vector<8x16xf32>
    %140 = arith.mulf %137, %139 : vector<8x16xf32>
    %141 = arith.addf %135, %140 : vector<8x16xf32>
    %c1_109 = arith.constant 1 : index
    %c1_110 = arith.constant 1 : index
    %c0_111 = arith.constant 0 : index
    %c0_112 = arith.constant 0 : index
    %142 = vector.load %arg4[%c1_109, %c1_110, %c0_111, %c0_112] : memref<2x3x8x16xf32, #tpu.memory_space<vmem>>, vector<1x1x8x16xf32>
    %143 = vector.shape_cast %142 : vector<1x1x8x16xf32> to vector<8x16xf32>
    %144 = vector.shape_cast %141 : vector<8x16xf32> to vector<1x1x8x16xf32>
    tpu.vector_store %arg4[%c1_109, %c1_110, %c0_111, %c0_112], %144 {strides = array<i32>} : memref<2x3x8x16xf32, #tpu.memory_space<vmem>>, vector<1x1x8x16xf32>,
    %c1_113 = arith.constant 1 : index
    %c0_114 = arith.constant 0 : index
    %c0_115 = arith.constant 0 : index
    %c0_116 = arith.constant 0 : index
    %145 = vector.load %arg3[%c1_113, %c0_114, %c0_115, %c0_116] : memref<2x4x8x16xf32, #tpu.memory_space<vmem>>, vector<1x1x8x16xf32>
    %146 = vector.shape_cast %145 : vector<1x1x8x16xf32> to vector<8x16xf32>
    %c8_117 = arith.constant 8 : index
    %147 = memref.load %arg1[%c8_117] : memref<12xf32, #tpu.memory_space<smem>>
    %148 = vector.broadcast %147 : f32 to vector<8x16xf32>
    %149 = arith.mulf %146, %148 : vector<8x16xf32>
    %c2_118 = arith.constant 2 : index
    %150 = memref.load %arg2[%c2_118] : memref<3xf32, #tpu.memory_space<smem>>
    %151 = vector.broadcast %150 : f32 to vector<8x16xf32>
    %152 = arith.addf %149, %151 : vector<8x16xf32>
    %c1_119 = arith.constant 1 : index
    %c1_120 = arith.constant 1 : index
    %c0_121 = arith.constant 0 : index
    %c0_122 = arith.constant 0 : index
    %153 = vector.load %arg3[%c1_119, %c1_120, %c0_121, %c0_122] : memref<2x4x8x16xf32, #tpu.memory_space<vmem>>, vector<1x1x8x16xf32>
    %154 = vector.shape_cast %153 : vector<1x1x8x16xf32> to vector<8x16xf32>
    %c9_123 = arith.constant 9 : index
    %155 = memref.load %arg1[%c9_123] : memref<12xf32, #tpu.memory_space<smem>>
    %156 = vector.broadcast %155 : f32 to vector<8x16xf32>
    %157 = arith.mulf %154, %156 : vector<8x16xf32>
    %158 = arith.addf %152, %157 : vector<8x16xf32>
    %c1_124 = arith.constant 1 : index
    %c2_125 = arith.constant 2 : index
    %c0_126 = arith.constant 0 : index
    %c0_127 = arith.constant 0 : index
    %159 = vector.load %arg3[%c1_124, %c2_125, %c0_126, %c0_127] : memref<2x4x8x16xf32, #tpu.memory_space<vmem>>, vector<1x1x8x16xf32>
    %160 = vector.shape_cast %159 : vector<1x1x8x16xf32> to vector<8x16xf32>
    %c10_128 = arith.constant 10 : index
    %161 = memref.load %arg1[%c10_128] : memref<12xf32, #tpu.memory_space<smem>>
    %162 = vector.broadcast %161 : f32 to vector<8x16xf32>
    %163 = arith.mulf %160, %162 : vector<8x16xf32>
    %164 = arith.addf %158, %163 : vector<8x16xf32>
    %c1_129 = arith.constant 1 : index
    %c3_130 = arith.constant 3 : index
    %c0_131 = arith.constant 0 : index
    %c0_132 = arith.constant 0 : index
    %165 = vector.load %arg3[%c1_129, %c3_130, %c0_131, %c0_132] : memref<2x4x8x16xf32, #tpu.memory_space<vmem>>, vector<1x1x8x16xf32>
    %166 = vector.shape_cast %165 : vector<1x1x8x16xf32> to vector<8x16xf32>
    %c11_133 = arith.constant 11 : index
    %167 = memref.load %arg1[%c11_133] : memref<12xf32, #tpu.memory_space<smem>>
    %168 = vector.broadcast %167 : f32 to vector<8x16xf32>
    %169 = arith.mulf %166, %168 : vector<8x16xf32>
    %170 = arith.addf %164, %169 : vector<8x16xf32>
    %c1_134 = arith.constant 1 : index
    %c2_135 = arith.constant 2 : index
    %c0_136 = arith.constant 0 : index
    %c0_137 = arith.constant 0 : index
    %171 = vector.load %arg4[%c1_134, %c2_135, %c0_136, %c0_137] : memref<2x3x8x16xf32, #tpu.memory_space<vmem>>, vector<1x1x8x16xf32>
    %172 = vector.shape_cast %171 : vector<1x1x8x16xf32> to vector<8x16xf32>
    %173 = vector.shape_cast %170 : vector<8x16xf32> to vector<1x1x8x16xf32>
    tpu.vector_store %arg4[%c1_134, %c2_135, %c0_136, %c0_137], %173 {strides = array<i32>} : memref<2x3x8x16xf32, #tpu.memory_space<vmem>>, vector<1x1x8x16xf32>,
    return
  }
  func.func @transform_0(%arg0: i32) -> i32 {
    %c0_i32 = arith.constant 0 : i32
    %c0_i32_0 = arith.constant 0 : i32
    return %c0_i32 : i32
  }
  func.func @transform_1(%arg0: i32) -> i32 {
    %c0_i32 = arith.constant 0 : i32
    %c0_i32_0 = arith.constant 0 : i32
    return %c0_i32 : i32
  }
  func.func @transform_2(%arg0: i32) -> (i32, i32, i32, i32) {
    %c0_i32 = arith.constant 0 : i32
    %c0_i32_0 = arith.constant 0 : i32
    %c0_i32_1 = arith.constant 0 : i32
    %c0_i32_2 = arith.constant 0 : i32
    return %c0_i32, %c0_i32_0, %arg0, %c0_i32_1 : i32, i32, i32, i32
  }
  func.func @transform_3(%arg0: i32) -> (i32, i32, i32, i32) {
    %c0_i32 = arith.constant 0 : i32
    %c0_i32_0 = arith.constant 0 : i32
    %c0_i32_1 = arith.constant 0 : i32
    %c0_i32_2 = arith.constant 0 : i32
    return %c0_i32, %c0_i32_0, %arg0, %c0_i32_1 : i32, i32, i32, i32
  }
}

</mosaic_0001>

<bundles_post_ra>
// kernel: tpu_custom_call.1
= control target key start
LH: loop header
LB: loop body
LE: loop exit
PB: predicated region body
PF: predicated region fallthrough
CT: control target
= control target key end

     0   :  { %8 = vsyncpa [#allocation5], 0  ;;  %s1055_s0 = inlined_call_operand.hbm [shape: f32[12], index: 0, kind: input, shape index: {}]   ;;  %s1056_s1 = inlined_call_operand.vmem [shape: f32[3], index: 1, kind: input, shape index: {}]   ;;  %s1057_s2 = inlined_call_operand.hbm [shape: f32[2,4,16,16], index: 2, kind: input, shape index: {}]   ;;  %s1058_s3 = inlined_call_operand.hbm [shape: f32[2,3,16,16], index: 3, kind: output, shape index: {}]  }
   0x1   :  { %9 = vsyncpa [#allocation6], 0 }
   0x2   :  { %10 = vsyncpa [#allocation3], 0 }
   0x3   :  { %12 = vsyncpa [#allocation3 + $0x1], 0 }
   0x4   :  { %13 = vsyncpa [#allocation4], 0 }
   0x5   :  { %15 = vsyncpa [#allocation4 + $0x1], 0  ;;  %s778_s12 = smov 0   ;;  %s780_s13 = smov 0  }
   0x6   :  { %s782_s14 = smov 0   ;;  %s784_s15 = smov 0  }
   0x7 LB: > { %s799_s16 = sadd.s32 4294967295, %s746_s15   ;;  %s474_s17 = sadd.s32 4294967294, %s746_s15   ;;  %s746_s15 = sphi %s784_s15, %s1081_s15   ;;  %s742_s14 = sphi %s782_s14, %s1080_s14   ;;  %s738_s13 = sphi %s780_s13, %s1079_s13   ;;  %s734_s12 = sphi %s778_s12, %s1078_s12  }
   0x8   : > { %s803_s18 = sadd.s32 1, %s746_s15   ;;  %s70_s19 = sadd.s32 1, %s742_s14 }
   0x9   : > { %s67_s20 = ssub.s32 %s746_s15, %s803_s18  ;;  %p77_p0 = scmp.ne.s32.totalorder %s742_s14, %s738_s13 }
   0xa   : > { %p68_p1 = scmp.eq.s32.totalorder %s67_s20, 0  ;;  %p78_p2 = scmp.eq.s32.totalorder %s746_s15, 0 }
   0xb   : > { %p83_p3 = scmp.ne.s32.totalorder %s738_s13, %s734_s12  ;;  %p1059_p4 = scmp.eq.s32.totalorder %s799_s16, 0 }
   0xc   : > { %s815_s21 = scalar_select %p68_p1, %s742_s14, %s70_s19  }
   0xd   : > { %p817_p5 = por %p78_p2, %p77_p0  ;;  %p823_p6 = por %p1059_p4, %p83_p3 }
   0xe   : > { %p107_p7 = scmp.eq.s32.totalorder %s799_s16, 1  ;;  %p113_p8 = scmp.eq.s32.totalorder %s474_s17, 1 }
   0xf   : > { %s1063_s23 = scalar_select %p823_p6, 1, 0 }
  0x10   : > { %p475_p9 = scmp.ge.s32.totalorder %s746_s15, 1  ;;  %p120_p10 = scmp.lt.s32.totalorder %s746_s15, 3 }
  0x11   : > { %p830_p11 = por %p107_p7, %p77_p0  ;;  %p834_p12 = por %p113_p8, %p83_p3 }
  0x12   : > { %p838_p13 = pnand %p475_p9, %p120_p10  ;;  %p570_p4 = scmp.lt.s32.totalorder %s746_s15, 2 }
  0x13   : > { %s1064_s24 = scalar_select %p830_p11, 1, 0 }
  0x14   : > { %s1065_s25 = scalar_select %p834_p12, 1, 0 }
  0x15   : > { %p553_p2 = pneg %p838_p13  ;;  %s142_s29 = sshll.u32 %s1056_s1, 4  ;;  %s143_s29 = int_to_ptr.vmem [resolvable:$true] %s142_s29 }
  0x16   : > { %p1067_p0 = scmp.eq.s32.totalorder %s799_s16, 0  ;;  %p857_p3 = pnand %p570_p4, %p817_p5 }
  0x17   : > { %s153_s5 = sand.u32 1, %s742_s14   ;;  %s614_s8 = scalar_lea.hbm %s1055_s0, 16 }
  0x18   : > { %p851_p7 = pnand %p553_p2, %p1067_p0  ;;  %p615_p8 = scmp.ne.s32.totalorder %s1055_s0, %s614_s8 }
  0x19   : > { %p621_p4 = scmp.lt.u32.totalorder %s614_s8, %s1055_s0 }
  0x1a   : > { %p616_p9 = pneg %p851_p7 }
  0x1c   : > { %p617_p10 = pnand %p616_p9, %p615_p8 }
  0x1e   : > { %p618_p2 = pneg %p617_p10 }
  0x20   : > { %p623_p5 = pnand %p621_p4, %p618_p2 }
  0x22   : > { %626 = shalt.err (!%p623_p5)
}
  0x23   : > { %s748_s19 = smov [#allocation2]   ;;  %s627_s27 = scalar_lea.vmem %s143_s29, 16 }
  0x24   : > { %556 = dma.hbm_to_smem (!%p851_p7), %s1055_s0, 16, %s748_s19, [#allocation5]  }
  0x25   : > { %p628_p0 = scmp.ne.s32.totalorder %s143_s29, %s627_s27  ;;  %p635_p11 = scmp.lt.s32.totalorder %s143_s29, %s143_s29 }
  0x26   : > { %p636_p8 = scmp.lt.s32.totalorder %s627_s27, %s627_s27 }
  0x27   : > { %p630_p1 = pnand %p628_p0, %p616_p9 }
  0x28   : > { %p637_p10 = por %p636_p8, %p635_p11 }
  0x29   : > { %p631_p12 = pneg %p630_p1 }
  0x2b   : > { %p638_p6 = pnand %p637_p10, %p631_p12 }
  0x2d   : > { %641 = shalt.err (!%p638_p6)
}
  0x2e   : > { %s749_s28 = smov [#allocation7]   ;;  %s479_s6 = sshll.u32 %s153_s5, 6 }
  0x2f   : > { %559 = dma.vmem_to_smem (!%p851_p7), %s143_s29, 16, %s749_s28, [#allocation6]  }
  0x30   : > { %s480_s7 = sshll.u32 %s746_s15, 7  ;;  %s157_s11 = scalar_lea.vmem [#allocation8], %s479_s6 }
  0x31   : > { %s884_s10 = scalar_lea.hbm %s1057_s2, %s480_s7  ;;  %s163_s17 = sshll.u32 %s157_s11, 4  ;;  %s886_s17 = int_to_ptr.vmem [resolvable:$true] %s163_s17 }
  0x32   : > { %s888_s30 = scalar_lea.sflag [#allocation3], %s153_s5  ;;  %s642_s19 = scalar_lea.hbm %s884_s10, 1024 }
  0x33   : > { %p643_p6 = scmp.ne.s32.totalorder %s884_s10, %s642_s19  ;;  %p644_p11 = pneg %p857_p3 }
  0x34   : > { %s647_s22 = scalar_lea.hbm %s1057_s2, 2048  ;;  %p648_p7 = scmp.lt.u32.totalorder %s884_s10, %s1057_s2 }
  0x35   : > { %p645_p12 = pnand %p644_p11, %p643_p6  ;;  %p649_p9 = scmp.lt.u32.totalorder %s647_s22, %s642_s19 }
  0x36   : > { %p651_p4 = scmp.lt.u32.totalorder %s642_s19, %s884_s10 }
  0x37   : > { %p646_p1 = pneg %p645_p12  ;;  %p650_p2 = por %p649_p9, %p648_p7 }
  0x39   : > { %p652_p5 = por %p651_p4, %p650_p2 }
  0x3b   : > { %p653_p0 = pnand %p652_p5, %p646_p1 }
  0x3d   : > { %656 = shalt.err (!%p653_p0)
}
  0x3e   : > { %s657_s5 = scalar_lea.vmem %s886_s17, 1024  ;;  %s750_s6 = smov [#allocation8]  }
  0x3f   : > { %p658_p8 = scmp.ne.s32.totalorder %s886_s17, %s657_s5  ;;  %s662_s7 = sshll.u32 %s750_s6, 4  ;;  %s663_s7 = int_to_ptr.vmem [resolvable:$false] %s662_s7 }
  0x40   : > { %s664_s8 = scalar_lea.vmem %s663_s7, 2048  ;;  %p665_p12 = scmp.lt.s32.totalorder %s886_s17, %s663_s7 }
  0x41   : > { %p660_p10 = pnand %p658_p8, %p644_p11  ;;  %p666_p7 = scmp.lt.s32.totalorder %s664_s8, %s657_s5 }
  0x43   : > { %p661_p6 = pneg %p660_p10  ;;  %p667_p9 = por %p666_p7, %p665_p12 }
  0x45   : > { %p668_p2 = pnand %p667_p9, %p661_p6 }
  0x47   : > { %671 = shalt.err (!%p668_p2)
}
  0x48   : > { %s751_s9 = smov 256   ;;  %s752_s11 = smov 128  }
  0x49   : > { %s753_s19 = smov 8   ;;  %175 = sbr.rel (%p838_p13) target bundleno = 135 (0x87), region = 32 }
  0x4a   : > { %563 = dma.hbm_to_vmem [thread:$0]  (!%p857_p3), %s884_s10, 1024, %s886_s17, %s888_s30, %s751_s9, %s752_s11, %s753_s19  }
  0x4b   : > { %p1070_p11 = scmp.eq.s32.totalorder (!%p838_p13), %s799_s16, 0 }
  0x50   : > { %717 = dma.done.wait (%p1070_p11), [#allocation5], 16   ;;  %p1071_p1 = pmov %p1070_p11 }
  0x52   : > { %719 = vsyncadd (%p1071_p1), [#allocation5], 4294967280  ;;  %p1072_p4 = pmov %p1071_p1 }
  0x53   : > { %p1073_p5 = pmov %p1071_p1 }
  0x54   : > { %721 = dma.done.wait (%p1072_p4), [#allocation6], 16  }
  0x55   : > { %723 = vsyncadd (%p1073_p5), [#allocation6], 4294967280  ;;  %s927_s29 = sand.u32 1, %s738_s13   ;;  %p1074_p13 = scmp.ne.s32.totalorder %s1063_s23, 0 }
  0x56   : > { %s484_s26 = sshll.u32 %s927_s29, 6  ;;  %s186_s4 = scalar_lea.sflag [#allocation3], %s927_s29 }
  0x57   : > { %s189_s10 = scalar_lea.vmem [#allocation8], %s484_s26 }
  0x58   : > { %725 = dma.done.wait (%p1074_p13), %s186_s4, 1024  }
  0x59   : > { %727 = vsyncadd (%p1074_p13), %s186_s4, 4294966272 }
  0x5a   : > { %194 = sfence }
  0x5b   : > { %s214_s17 = sld [smem:[#allocation2]]  ;;  %s486_s20 = sld [smem:[#allocation2 + $0x1]]  ;;  %v213_v0 = vld [vmem:[%s189_s10] sm:$0xff]  ;;  %v485_v2 = vld [vmem:[%s189_s10 + $0x8] sm:$0xff]  ;;  %v487_v5 = vld [vmem:[%s189_s10 + $0x10] sm:$0xff]  ;;  %vm238_vm0 = vcmask 130048  }
  0x5c   : > { %s935_s30 = sld [smem:[#allocation7]]  ;;  %s937_s22 = sld [smem:[#allocation2 + $0x2]]  ;;  %v943_v1 = vld [vmem:[%s189_s10 + $0x20] sm:$0xff]  ;;  %v949_v3 = vld [vmem:[%s189_s10 + $0x28] sm:$0xff]  ;;  %v489_v6 = vld [vmem:[%s189_s10 + $0x18] sm:$0xff] }
  0x5d   : > { %s939_s27 = sld [smem:[#allocation2 + $0x3]]  ;;  %s941_s28 = sld [smem:[#allocation2 + $0x4]]  ;;  %v512_v11 = vld [vmem:[%s189_s10 + $0x30] sm:$0xff]  ;;  %v961_v12 = vld [vmem:[%s189_s10 + $0x38] sm:$0xff] }
  0x5e   : > { %s945_s5 = sld [smem:[#allocation7 + $0x1]]  ;;  %s947_s23 = sld [smem:[#allocation2 + $0x5]] }
  0x5f   : > { %s951_s6 = sld [smem:[#allocation2 + $0x6]]  ;;  %s953_s7 = sld [smem:[#allocation2 + $0x7]] }
  0x60   : > { %s956_s8 = sld [smem:[#allocation2 + $0x8]]  ;;  %s958_s9 = sld [smem:[#allocation7 + $0x2]] }
  0x61   : > { %v215_v4 = vstv %s214_s17  ;;  %v223_v9 = vstv %s486_s20  ;;  %s964_s11 = sld [smem:[#allocation2 + $0x9]]  ;;  %s966_s19 = sld [smem:[#allocation2 + $0xa]] }
  0x62   : > { %v216_v7 = vmul.f32 %v215_v4, %v213_v0  ;;  %v218_v8 = vstv %s935_s30  ;;  %v292_v10 = vmul.f32 %v943_v1, %v215_v4  ;;  %v224_v13 = vmul.f32 %v485_v2, %v223_v9  ;;  %s970_s26 = sld [smem:[#allocation2 + $0xb]]  ;;  %s540_s4 = smul.u32 48, %s927_s29 }
  0x63   : > { %v229_v14 = vstv %s937_s22  ;;  %v300_v15 = vmul.f32 %v949_v3, %v223_v9  ;;  %v235_v18 = vstv %s939_s27  ;;  %v242_v21 = vstv %s941_s28  ;;  %s537_s30 = sshll.u32 %s799_s16, 7  ;;  %s365_s16 = scalar_lea.sflag [#allocation4], %s927_s29 }
  0x64   : > { %v219_v16 = vadd.f32 %v218_v8, %v216_v7  ;;  %v230_v17 = vmul.f32 %v487_v5, %v229_v14  ;;  %v295_v19 = vadd.f32 %v292_v10, %v218_v8  ;;  %v236_v20 = vmul.f32 %v489_v6, %v235_v18  ;;  %s985_s10 = scalar_lea.vmem [#allocation9], %s540_s4  ;;  %s1009_s27 = scalar_lea.hbm %s1058_s3, %s537_s30 }
  0x65   : > { %v306_v22 = vmul.f32 %v512_v11, %v229_v14  ;;  %v312_v23 = vmul.f32 %v961_v12, %v235_v18  ;;  %v243_v25 = vmul.f32 %v242_v21, %v213_v0  ;;  %v245_v26 = vstv %s945_s5  ;;  %s377_s17 = sshll.u32 %s985_s10, 4  ;;  %p1075_p0 = scmp.ne.s32.totalorder %s1064_s24, 0  ;;  %s1000_s17 = int_to_ptr.vmem [resolvable:$true] %s377_s17 }
  0x66   : > { %v225_v24 = vadd.f32 %v224_v13, %v219_v16  ;;  %v249_v27 = vstv %s947_s23  ;;  %v254_v29 = vstv %s951_s6  ;;  %v259_v30 = vstv %s953_s7  ;;  %s672_s28 = scalar_lea.vmem %s1000_s17, 768  ;;  %s754_s5 = smov [#allocation9]  }
  0x67   : > { %v250_v28 = vmul.f32 %v485_v2, %v249_v27  ;;  %v301_v31 = vadd.f32 %v300_v15, %v295_v19  ;;  %v246_v33 = vadd.f32 %v245_v26, %v243_v25  ;;  %v255_v34 = vmul.f32 %v487_v5, %v254_v29  ;;  %p673_p3 = scmp.ne.s32.totalorder %s1000_s17, %s672_s28  ;;  %s676_s23 = sshll.u32 %s754_s5, 4  ;;  %s677_s23 = int_to_ptr.vmem [resolvable:$false] %s676_s23 }
  0x68   : > { %v231_v32 = vadd.f32 %v230_v17, %v225_v24  ;;  %v260_v35 = vmul.f32 %v489_v6, %v259_v30  ;;  %v266_v36 = vstv %s956_s8  ;;  %v269_v37 = vstv %s958_s9  ;;  %s678_s6 = scalar_lea.vmem %s677_s23, 1536  ;;  %p679_p6 = scmp.lt.s32.totalorder %s1000_s17, %s677_s23 }
  0x69   : > { %v273_v38 = vstv %s964_s11  ;;  %v278_v39 = vstv %s966_s19  ;;  %v251_v41 = vadd.f32 %v250_v28, %v246_v33  ;;  %v267_v42 = vmul.f32 %v266_v36, %v213_v0  ;;  %p674_p8 = pnand %p673_p3, %p1075_p0  ;;  %p680_p12 = scmp.lt.s32.totalorder %s678_s6, %s672_s28 }
  0x6a   : > { %v237_v40 = vadd.f32 %v236_v20, %v231_v32  ;;  %v274_v43 = vmul.f32 %v485_v2, %v273_v38  ;;  %v283_v44 = vstv %s970_s26  ;;  %v307_v45 = vadd.f32 %v306_v22, %v301_v31 }
  0x6b   : > { %v319_v46 = vmul.f32 %v943_v1, %v242_v21  ;;  %v256_v47 = vadd.f32 %v255_v34, %v251_v41  ;;  %v270_v48 = vadd.f32 %v269_v37, %v267_v42  ;;  %v279_v49 = vmul.f32 %v487_v5, %v278_v39  ;;  %p675_p10 = pneg %p674_p8  ;;  %p681_p7 = por %p680_p12, %p679_p6 }
  0x6c   : > { %239 = vst.msk [vmem:[%s985_s10] sm:$0xff] %vm238_vm0, %v237_v40  ;;  %v326_v50 = vmul.f32 %v949_v3, %v249_v27  ;;  %v284_v51 = vmul.f32 %v489_v6, %v283_v44  ;;  %v313_v52 = vadd.f32 %v312_v23, %v307_v45  ;;  %v331_v54 = vmul.f32 %v512_v11, %v254_v29 }
  0x6d   : > { %v322_v53 = vadd.f32 %v319_v46, %v245_v26  ;;  %v261_v55 = vadd.f32 %v260_v35, %v256_v47  ;;  %v275_v56 = vadd.f32 %v274_v43, %v270_v48  ;;  %v343_v57 = vmul.f32 %v943_v1, %v266_v36  ;;  %p682_p9 = pnand %p681_p7, %p675_p10 }
  0x6e   : > { %v350_v58 = vmul.f32 %v949_v3, %v273_v38  ;;  %516 = vst.msk [vmem:[%s985_s10 + $0x18] sm:$0xff] %vm238_vm0, %v313_v52  ;;  %v336_v60 = vmul.f32 %v961_v12, %v259_v30  ;;  %v355_v63 = vmul.f32 %v512_v11, %v278_v39  ;;  %v360_v3 = vmul.f32 %v961_v12, %v283_v44 }
  0x6f   : > { %v327_v59 = vadd.f32 %v326_v50, %v322_v53  ;;  %499 = vst.msk [vmem:[%s985_s10 + $0x8] sm:$0xff] %vm238_vm0, %v261_v55  ;;  %v280_v61 = vadd.f32 %v279_v49, %v275_v56  ;;  %v346_v62 = vadd.f32 %v343_v57, %v269_v37 }
  0x71   : > { %v332_v0 = vadd.f32 %v331_v54, %v327_v59  ;;  %v285_v1 = vadd.f32 %v284_v51, %v280_v61  ;;  %v351_v2 = vadd.f32 %v350_v58, %v346_v62 }
  0x73   : > { %v337_v4 = vadd.f32 %v336_v60, %v332_v0  ;;  %508 = vst.msk [vmem:[%s985_s10 + $0x10] sm:$0xff] %vm238_vm0, %v285_v1  ;;  %v356_v5 = vadd.f32 %v355_v63, %v351_v2 }
  0x75   : > { %526 = vst.msk [vmem:[%s985_s10 + $0x20] sm:$0xff] %vm238_vm0, %v337_v4  ;;  %v361_v6 = vadd.f32 %v360_v3, %v356_v5 }
  0x77   : > { %536 = vst.msk [vmem:[%s985_s10 + $0x28] sm:$0xff] %vm238_vm0, %v361_v6 }
  0x78   : > { %685 = shalt.err (!%p682_p9)
}
  0x79   : > { %s686_s7 = scalar_lea.hbm %s1009_s27, 768  ;;  %s690_s11 = scalar_lea.hbm %s1058_s3, 1536 }
  0x7a   : > { %p687_p2 = scmp.ne.s32.totalorder %s1009_s27, %s686_s7  ;;  %p691_p4 = scmp.lt.u32.totalorder %s1009_s27, %s1058_s3 }
  0x7b   : > { %p692_p5 = scmp.lt.u32.totalorder %s690_s11, %s686_s7  ;;  %p694_p3 = scmp.lt.u32.totalorder %s686_s7, %s1009_s27 }
  0x7c   : > { %p688_p11 = pnand %p687_p2, %p1075_p0 }
  0x7d   : > { %p693_p13 = por %p692_p5, %p691_p4 }
  0x7e   : > { %p689_p1 = pneg %p688_p11 }
  0x7f   : > { %p695_p8 = por %p694_p3, %p693_p13 }
  0x81   : > { %p696_p10 = pnand %p695_p8, %p689_p1 }
  0x83   : > { %699 = shalt.err (!%p696_p10)
}
  0x84   : > { %s755_s4 = smov 128   ;;  %s756_s10 = smov 256  }
  0x85   : > { %s757_s30 = smov 8  }
  0x86   : > { %551 = dma.vmem_to_hbm [thread:$0]  (%p1075_p0), %s1000_s17, 768, %s1009_s27, %s365_s16, %s755_s4, %s756_s10, %s757_s30  }
  0x87 PF: > { %s392_s20 = sand.u32 1, %s734_s12   ;;  %p1076_p6 = scmp.ne.s32.totalorder %s1065_s25, 0 }
  0x88   : > { %p1077_p12 = scmp.ge.s32.totalorder %s746_s15, 2  ;;  %s393_s22 = scalar_lea.sflag [#allocation4], %s392_s20 }
  0x8a   : > { %p565_p7 = pnand %p1077_p12, %p1076_p6 }
  0x8c   : > { %729 = dma.done.wait (!%p565_p7), %s393_s22, 768  }
  0x8d   : > { %731 = vsyncadd (!%p565_p7), %s393_s22, 4294966528  ;;  %p18_p9 = scmp.ge.s32.totalorder %s803_s18, 4   ;;  %s1078_s12 = smov %s738_s13 }
  0x8e   : > { %s1079_s13 = smov %s742_s14  ;;  %s1080_s14 = smov %s815_s21 }
  0x8f   : > { %s1081_s15 = smov %s803_s18  ;;  %20 = sbr.rel (!%p18_p9) target bundleno = 7 (0x7), region = 99 }
  0x96   :  { %398 = vsyncpa [#allocation3], 1 }
  0x97   :  { %400 = vsyncpa [#allocation3 + $0x1], 1 }
  0x98   :  { %401 = vsyncpa [#allocation4], 1 }
  0x99   :  { %403 = vsyncpa [#allocation4 + $0x1], 1 }
  0x9a   :  { %404 = vsyncpa [#allocation5], 1 }
  0x9b   :  { %406 = vsyncpa [#allocation5 + $0x1], 1 }
  0x9c   :  { %407 = vsyncpa [#allocation6], 1 }
  0x9d   :  { %409 = vsyncpa [#allocation6 + $0x1], 1 }

</bundles_post_ra>
